<compile_context>
chip_gen: v6e
topology: v6e:2x2x1
jax: 0.10.0
libtpu: 0.0.40
codegen_flags: <defaults>
</compile_context>

<pallas_src>
import functools
import math

import jax
import jax.numpy as jnp
from jax import lax
from jax.experimental import pallas as pl
from jax.experimental.pallas import tpu as pltpu

# Make the pure-JAX reference and the in-kernel f32 matmuls use the same (full
# f32) precision so the correctness check is meaningful on real TPUs.
jax.config.update("jax_default_matmul_precision", "highest")


# ---------------------------------------------------------------------------
# Small helpers
# ---------------------------------------------------------------------------
def _round_up(x, m):
    return ((x + m - 1) // m) * m


def _pad_to(x, shape):
    """Zero-pad trailing regions of `x` up to `shape` (same rank)."""
    pads = [(0, t - s) for s, t in zip(x.shape, shape)]
    if not any(p[1] for p in pads):
        return x
    return jnp.pad(x, pads)


def _pick_tile(dim, candidates):
    """Largest candidate that evenly divides `dim`, else the full dim (small T only)."""
    for c in candidates:
        if c <= dim and dim % c == 0:
            return c
    return dim


# ---------------------------------------------------------------------------
# Fused Q/K/V projection:  y[g] = x[g] @ Wt[g] + b[g]
#   xs: (G, M, K)   ws_t: (G, K, N)  (already transposed, canonical MXU feed)
#   bs: (G, N)      returns (G, M, N)
# Non-divisible M/N/K are zero-padded to tile multiples and sliced afterwards.
# ---------------------------------------------------------------------------
def _qkv_linear_kernel(x_ref, wt_ref, b_ref, o_ref, acc_ref):
    k = pl.program_id(3)

    @pl.when(k == 0)
    def _():
        acc_ref[...] = jnp.zeros_like(acc_ref)

    acc_ref[...] += lax.dot_general(
        x_ref[...], wt_ref[...],
        (((1,), (0,)), ((), ())),
        preferred_element_type=jnp.float32)

    @pl.when(k == pl.num_programs(3) - 1)
    def _():
        o_ref[...] = (acc_ref[...] + b_ref[...].astype(jnp.float32)).astype(o_ref.dtype)


def pallas_stacked_linear(xs, ws_t, bs):
    G, M, K = xs.shape
    N = ws_t.shape[2]

    tm = min(256, _round_up(M, 8))
    tn = min(256, _round_up(N, 128))
    tk = min(512, _round_up(K, 128))
    Mp, Np, Kp = _round_up(M, tm), _round_up(N, tn), _round_up(K, tk)

    xs_p = _pad_to(xs, (G, Mp, Kp))
    ws_p = _pad_to(ws_t, (G, Kp, Np))
    bs_p = _pad_to(bs, (G, Np)).reshape(G, 1, Np)

    grid = (G, Mp // tm, Np // tn, Kp // tk)
    out = pl.pallas_call(
        _qkv_linear_kernel,
        out_shape=jax.ShapeDtypeStruct((G, Mp, Np), xs.dtype),
        grid_spec=pltpu.PrefetchScalarGridSpec(
            num_scalar_prefetch=0,
            grid=grid,
            in_specs=[
                pl.BlockSpec((None, tm, tk), lambda g, i, j, k: (g, i, k)),
                pl.BlockSpec((None, tk, tn), lambda g, i, j, k: (g, k, j)),
                pl.BlockSpec((None, 1, tn), lambda g, i, j, k: (g, 0, j)),
            ],
            out_specs=pl.BlockSpec((None, tm, tn), lambda g, i, j, k: (g, i, j)),
            scratch_shapes=[pltpu.VMEM((tm, tn), jnp.float32)],
        ),
        compiler_params=pltpu.CompilerParams(
            dimension_semantics=("parallel", "parallel", "parallel", "arbitrary")),
    )(xs_p, ws_p, bs_p)
    return out[:, :M, :N]


# ---------------------------------------------------------------------------
# Attention core with fused output projection.
#   grid = (B, T // tq); per step the refs are:
#     q_ref  : (tq, H, DK)   k_ref/v_ref : (T, H, DK)
#     wot_ref: (C, C)  (Wout^T, resident)   bo_ref: (1, C)
#     o_ref  : (tq, C)  (lane-dense, final module output for this tile, pre-transpose)
# Each head's context is contracted with its Wout^T row-slice and accumulated
# in f32, so the (T*B, C) context never touches HBM.
# ---------------------------------------------------------------------------
def _attn_out_kernel(q_ref, k_ref, v_ref, wot_ref, bo_ref, o_ref, *, scale, n_head, d_k):
    tq = q_ref.shape[0]
    C = wot_ref.shape[1]
    acc = jnp.zeros((tq, C), jnp.float32)

    for h in range(n_head):                          # heads consumed immediately into acc
        q = q_ref[:, h, :] * scale                   # scale folded into q (tq*d_k muls)
        k = k_ref[:, h, :]
        v = v_ref[:, h, :]
        s = lax.dot_general(q, k, (((1,), (1,)), ((), ())),
                            preferred_element_type=jnp.float32)          # (tq, T)
        m = jnp.max(s, axis=-1, keepdims=True)
        e = jnp.exp(s - m)
        p = e / jnp.sum(e, axis=-1, keepdims=True)                        # exact softmax
        ctx = jnp.dot(p.astype(v.dtype), v,
                      preferred_element_type=jnp.float32)                 # (tq, d_k)
        wo_h = wot_ref[h * d_k:(h + 1) * d_k, :]                          # (d_k, C), static slice
        acc = acc + jnp.dot(ctx.astype(wo_h.dtype), wo_h,
                            preferred_element_type=jnp.float32)           # (tq, C)

    o_ref[...] = (acc + bo_ref[...].astype(jnp.float32)).astype(o_ref.dtype)


def pallas_attention_out(qkv5, w_out_t, b_out):
    """qkv5: (3, T, B, H, DK);  w_out_t: (C, C) = Wout^T;  returns (B, T, C)."""
    _, T, B, H, DK = qkv5.shape
    C = H * DK
    tq = _pick_tile(T, (256, 128, 64, 32, 16, 8))
    scale = 1.0 / math.sqrt(DK)
    kernel = functools.partial(_attn_out_kernel, scale=scale, n_head=H, d_k=DK)

    return pl.pallas_call(
        kernel,
        out_shape=jax.ShapeDtypeStruct((B, T, C), qkv5.dtype),
        grid_spec=pltpu.PrefetchScalarGridSpec(
            num_scalar_prefetch=0,
            grid=(B, T // tq),
            in_specs=[
                pl.BlockSpec((None, tq, None, H, DK), lambda b, qt: (0, qt, b, 0, 0)),  # q tile
                pl.BlockSpec((None, T, None, H, DK), lambda b, qt: (1, 0, b, 0, 0)),    # k (resident over qt)
                pl.BlockSpec((None, T, None, H, DK), lambda b, qt: (2, 0, b, 0, 0)),    # v (resident over qt)
                pl.BlockSpec((C, C), lambda b, qt: (0, 0)),                              # Wout^T (resident)
                pl.BlockSpec((1, C), lambda b, qt: (0, 0)),                              # bout
            ],
            out_specs=pl.BlockSpec((None, tq, C), lambda b, qt: (b, qt, 0)),             # lane-dense (tq, C)
        ),
        compiler_params=pltpu.CompilerParams(
            dimension_semantics=("parallel", "parallel")),
    )(qkv5, qkv5, qkv5, w_out_t, b_out.reshape(1, C))


# ---------------------------------------------------------------------------
# Full module forward
# ---------------------------------------------------------------------------
def espnet_mha_forward(query, key, value, params, key_padding_mask=None):
    """query/key/value: (T, B, C).  Returns ((T, B, C), None)."""
    if key_padding_mask is not None:
        # TODO(synk): key_padding_mask is not implemented in the Pallas path.
        raise NotImplementedError("key_padding_mask not supported in this demo")

    T, B, C = query.shape
    H = params["h"]
    DK = C // H
    M = T * B

    xs = jnp.stack([query.reshape(M, C), key.reshape(M, C), value.reshape(M, C)], axis=0)
    # Pre-transpose weights once (host/XLA, constant-foldable) -> canonical MXU feed.
    ws_t = jnp.stack([params["Wq"].T, params["Wk"].T, params["Wv"].T], axis=0)   # (3, K, N)
    bs = jnp.stack([params["bq"], params["bk"], params["bv"]], axis=0)

    qkv = pallas_stacked_linear(xs, ws_t, bs)        # (3, M, C) -- one launch
    qkv = qkv.reshape(3, T, B, H, DK)                # free reshape

    out_btc = pallas_attention_out(qkv, params["Wout"].T, params["bout"])  # (B, T, C)
    return jnp.transpose(out_btc, (1, 0, 2)), None   # final (T, B, C), like the module


# ---------------------------------------------------------------------------
# Pure-JAX reference (mirrors the PyTorch module)
# ---------------------------------------------------------------------------
def reference_forward(query, key, value, params):
    T, B, C = query.shape
    H = params["h"]
    DK = C // H

    def lin(x, w, b):
        return x @ w.T + b

    q = lin(jnp.transpose(query, (1, 0, 2)), params["Wq"], params["bq"])
    k = lin(jnp.transpose(key, (1, 0, 2)), params["Wk"], params["bk"])
    v = lin(jnp.transpose(value, (1, 0, 2)), params["Wv"], params["bv"])
    q = q.reshape(B, T, H, DK).transpose(0, 2, 1, 3)
    k = k.reshape(B, T, H, DK).transpose(0, 2, 1, 3)
    v = v.reshape(B, T, H, DK).transpose(0, 2, 1, 3)

    scores = jnp.einsum("bhtd,bhsd->bhts", q, k) / math.sqrt(DK)
    attn = jax.nn.softmax(scores, axis=-1)
    x = jnp.einsum("bhts,bhsd->bhtd", attn, v)
    x = x.transpose(0, 2, 1, 3).reshape(B, T, C)
    out = lin(x, params["Wout"], params["bout"])
    return jnp.transpose(out, (1, 0, 2))


# ---------------------------------------------------------------------------
def make_params(key, n_feat, n_head):
    keys = jax.random.split(key, 8)
    scale = 1.0 / math.sqrt(n_feat)
    return {
        "h": n_head,
        "Wq": jax.random.normal(keys[0], (n_feat, n_feat), jnp.float32) * scale,
        "bq": jax.random.normal(keys[1], (n_feat,), jnp.float32) * scale,
        "Wk": jax.random.normal(keys[2], (n_feat, n_feat), jnp.float32) * scale,
        "bk": jax.random.normal(keys[3], (n_feat,), jnp.float32) * scale,
        "Wv": jax.random.normal(keys[4], (n_feat, n_feat), jnp.float32) * scale,
        "bv": jax.random.normal(keys[5], (n_feat,), jnp.float32) * scale,
        "Wout": jax.random.normal(keys[6], (n_feat, n_feat), jnp.float32) * scale,
        "bout": jax.random.normal(keys[7], (n_feat,), jnp.float32) * scale,
    }


if __name__ == "__main__":
    T, B, C, H = 8, 2, 32, 4          # seq, batch, n_feat, n_head  (d_k = 8)

    root = jax.random.PRNGKey(0)
    k_params, k_q, k_k, k_v = jax.random.split(root, 4)
    params = make_params(k_params, C, H)

    query = jax.random.normal(k_q, (T, B, C), jnp.float32)
    key_t = jax.random.normal(k_k, (T, B, C), jnp.float32)
    value = jax.random.normal(k_v, (T, B, C), jnp.float32)

    out, _ = espnet_mha_forward(query, key_t, value, params)
    out = jax.block_until_ready(out)

    ref = reference_forward(query, key_t, value, params)
    assert out.shape == (T, B, C)
    assert out.dtype == query.dtype
    assert jnp.allclose(out, ref, atol=1e-3, rtol=1e-3), "mismatch vs reference"

    print("KERNEL_OK")
</pallas_src>

<mosaic_0001>
module attributes {stable_mosaic.version = 11 : i64} {
  func.func @_qkv_linear_kernel(%arg0: i32, %arg1: i32, %arg2: i32, %arg3: i32, %arg4: memref<1x16x128xf32, #tpu.memory_space<vmem>>, %arg5: memref<1x128x128xf32, #tpu.memory_space<vmem>>, %arg6: memref<1x1x128xf32, #tpu.memory_space<vmem>>, %arg7: memref<1x16x128xf32, #tpu.memory_space<vmem>>, %arg8: memref<16x128xf32, #tpu.memory_space<vmem>>) attributes {dimension_semantics = [#tpu.dimension_semantics<parallel>, #tpu.dimension_semantics<parallel>, #tpu.dimension_semantics<parallel>, #tpu.dimension_semantics<arbitrary>], iteration_bounds = array<i64: 3, 1, 1, 1>, scalar_prefetch = 0 : i64, scratch_operands = 1 : i64, tpu.core_type = #tpu.core_type<tc>, window_params = [{transform_indices = @transform_0, window_bounds = array<i64: 1, 16, 128>}, {transform_indices = @transform_1, window_bounds = array<i64: 1, 128, 128>}, {transform_indices = @transform_2, window_bounds = array<i64: 1, 1, 128>}, {transform_indices = @transform_3, window_bounds = array<i64: 1, 16, 128>}]} {
    %c0_i32 = arith.constant 0 : i32
    %0 = arith.cmpi eq, %arg3, %c0_i32 : i32
    %1 = arith.extui %0 : i1 to i32
    %c0_i32_0 = arith.constant 0 : i32
    %2 = arith.cmpi ne, %1, %c0_i32_0 : i32
    scf.if %2 {
      %cst_12 = arith.constant 0.000000e+00 : f32
      %14 = vector.broadcast %cst_12 : f32 to vector<16x128xf32>
      %c0_13 = arith.constant 0 : index
      %c0_14 = arith.constant 0 : index
      %15 = vector.load %arg8[%c0_13, %c0_14] : memref<16x128xf32, #tpu.memory_space<vmem>>, vector<16x128xf32>
      tpu.vector_store %arg8[%c0_13, %c0_14], %14 {strides = array<i32>} : memref<16x128xf32, #tpu.memory_space<vmem>>, vector<16x128xf32>,
    } else {
    }
    %c0 = arith.constant 0 : index
    %c0_1 = arith.constant 0 : index
    %3 = vector.load %arg8[%c0, %c0_1] : memref<16x128xf32, #tpu.memory_space<vmem>>, vector<16x128xf32>
    %c0_2 = arith.constant 0 : index
    %c0_3 = arith.constant 0 : index
    %c0_4 = arith.constant 0 : index
    %4 = vector.load %arg4[%c0_2, %c0_3, %c0_4] : memref<1x16x128xf32, #tpu.memory_space<vmem>>, vector<1x16x128xf32>
    %5 = vector.shape_cast %4 : vector<1x16x128xf32> to vector<16x128xf32>
    %c0_5 = arith.constant 0 : index
    %c0_6 = arith.constant 0 : index
    %c0_7 = arith.constant 0 : index
    %6 = vector.load %arg5[%c0_5, %c0_6, %c0_7] : memref<1x128x128xf32, #tpu.memory_space<vmem>>, vector<1x128x128xf32>
    %7 = vector.shape_cast %6 : vector<1x128x128xf32> to vector<128x128xf32>
    %cst = arith.constant dense<0.000000e+00> : vector<16x128xf32>
    %8 = tpu.matmul %5, %7, %cst {dimension_numbers = #tpu.dot_dimension_numbers<[1], [0], [0], [1], [0, 0, 1, 1], [], []>, precision = #tpu.contract_precision<fp32>} : vector<16x128xf32>, vector<128x128xf32>, vector<16x128xf32> -> vector<16x128xf32>
    %9 = arith.addf %3, %8 : vector<16x128xf32>
    %c0_8 = arith.constant 0 : index
    %c0_9 = arith.constant 0 : index
    %10 = vector.load %arg8[%c0_8, %c0_9] : memref<16x128xf32, #tpu.memory_space<vmem>>, vector<16x128xf32>
    tpu.vector_store %arg8[%c0_8, %c0_9], %9 {strides = array<i32>} : memref<16x128xf32, #tpu.memory_space<vmem>>, vector<16x128xf32>,
    %c0_i32_10 = arith.constant 0 : i32
    %11 = arith.cmpi eq, %arg3, %c0_i32_10 : i32
    %12 = arith.extui %11 : i1 to i32
    %c0_i32_11 = arith.constant 0 : i32
    %13 = arith.cmpi ne, %12, %c0_i32_11 : i32
    scf.if %13 {
      %c0_12 = arith.constant 0 : index
      %c0_13 = arith.constant 0 : index
      %14 = vector.load %arg8[%c0_12, %c0_13] : memref<16x128xf32, #tpu.memory_space<vmem>>, vector<16x128xf32>
      %c0_14 = arith.constant 0 : index
      %c0_15 = arith.constant 0 : index
      %c0_16 = arith.constant 0 : index
      %15 = vector.load %arg6[%c0_14, %c0_15, %c0_16] : memref<1x1x128xf32, #tpu.memory_space<vmem>>, vector<1x1x128xf32>
      %16 = vector.shape_cast %15 : vector<1x1x128xf32> to vector<1x128xf32>
      %17 = vector.broadcast %16 : vector<1x128xf32> to vector<16x128xf32>
      %18 = arith.addf %14, %17 : vector<16x128xf32>
      %c0_17 = arith.constant 0 : index
      %c0_18 = arith.constant 0 : index
      %c0_19 = arith.constant 0 : index
      %19 = vector.load %arg7[%c0_17, %c0_18, %c0_19] : memref<1x16x128xf32, #tpu.memory_space<vmem>>, vector<1x16x128xf32>
      %20 = vector.shape_cast %19 : vector<1x16x128xf32> to vector<16x128xf32>
      %21 = vector.shape_cast %18 : vector<16x128xf32> to vector<1x16x128xf32>
      tpu.vector_store %arg7[%c0_17, %c0_18, %c0_19], %21 {strides = array<i32>} : memref<1x16x128xf32, #tpu.memory_space<vmem>>, vector<1x16x128xf32>,
    } else {
    }
    return
  }
  func.func @transform_0(%arg0: i32, %arg1: i32, %arg2: i32, %arg3: i32) -> (i32, i32, i32) {
    %c0_i32 = arith.constant 0 : i32
    return %arg0, %arg1, %arg3 : i32, i32, i32
  }
  func.func @transform_1(%arg0: i32, %arg1: i32, %arg2: i32, %arg3: i32) -> (i32, i32, i32) {
    %c0_i32 = arith.constant 0 : i32
    return %arg0, %arg3, %arg2 : i32, i32, i32
  }
  func.func @transform_2(%arg0: i32, %arg1: i32, %arg2: i32, %arg3: i32) -> (i32, i32, i32) {
    %c0_i32 = arith.constant 0 : i32
    %c0_i32_0 = arith.constant 0 : i32
    return %arg0, %c0_i32, %arg2 : i32, i32, i32
  }
  func.func @transform_3(%arg0: i32, %arg1: i32, %arg2: i32, %arg3: i32) -> (i32, i32, i32) {
    %c0_i32 = arith.constant 0 : i32
    return %arg0, %arg1, %arg2 : i32, i32, i32
  }
}

</mosaic_0001>

<bundles_post_ra>
// kernel: tpu_custom_call.1
= control target key start
LH: loop header
LB: loop body
LE: loop exit
PB: predicated region body
PF: predicated region fallthrough
CT: control target
= control target key end

     0   :  { %s2318_s0 = inlined_call_operand.hbm [shape: f32[3,16,128], index: 0, kind: input, shape index: {}]   ;;  %s2319_s1 = inlined_call_operand.hbm [shape: f32[3,128,128], index: 1, kind: input, shape index: {}]   ;;  %s2320_s2 = inlined_call_operand.vmem [shape: f32[3,1,128], index: 2, kind: input, shape index: {}]   ;;  %s2321_s3 = inlined_call_operand.hbm [shape: f32[3,16,128], index: 3, kind: output, shape index: {}]  }
   0x1   :  { %2324 = sst [smem:[#allocation12_spill]] %s2318_s0 }
   0x2   :  { %8 = vsyncpa [#allocation4], 0 }
   0x3   :  { %10 = vsyncpa [#allocation4 + $0x1], 0 }
   0x4   :  { %11 = vsyncpa [#allocation7], 0 }
   0x5   :  { %13 = vsyncpa [#allocation7 + $0x1], 0 }
   0x6   :  { %14 = vsyncpa [#allocation5], 0 }
   0x7   :  { %16 = vsyncpa [#allocation5 + $0x1], 0  ;;  %s1763_s12 = smov 0   ;;  %s1765_s13 = smov 0  }
   0x8   :  { %s1767_s14 = smov 0   ;;  %s1769_s15 = smov 0  }
   0x9   :  { %s1771_s16 = smov 0   ;;  %s1773_s17 = smov 0  }
   0xa LB: > { %s1182_s18 = sadd.s32 4294967295, %s1734_s17   ;;  %s1183_s19 = sadd.s32 4294967294, %s1734_s17   ;;  %s1734_s17 = sphi %s1773_s17, %s22_s17   ;;  %s1730_s16 = sphi %s1771_s16, %s2338_s16   ;;  %s1726_s15 = sphi %s1769_s15, %s2337_s15   ;;  %s1722_s14 = sphi %s1767_s14, %s2336_s14   ;;  %s1718_s13 = sphi %s1765_s13, %s2335_s13   ;;  %s1714_s12 = sphi %s1763_s12, %s2334_s12  }
   0xb   : > { %s48_s20 = sadd.s32 1, %s1730_s16  ;;  %s59_s21 = sadd.s32 1, %s1722_s14 }
   0xc   : > { %p50_p0 = scmp.ge.s32.totalorder %s48_s20, 3  ;;  %p66_p1 = scmp.ne.s32.totalorder %s1722_s14, %s1718_s13 }
   0xd   : > { %p67_p2 = scmp.eq.s32.totalorder %s1734_s17, 0  ;;  %p72_p3 = scmp.ne.s32.totalorder %s1718_s13, %s1714_s12 }
   0xe   : > { %s2340_s20 = smov (%p50_p0, %s48_s20), 0  ;;  %p73_p5 = scmp.eq.s32.totalorder %s1182_s18, 0 }
   0xf   : > { %p1804_p4 = por %p67_p2, %p66_p1  ;;  %s52_s23 = ssub.s32 %s1730_s16, %s2340_s20 }
  0x10   : > { %p158_p6 = scmp.eq.s32.totalorder %s1182_s18, 2  ;;  %p57_p7 = scmp.eq.s32.totalorder %s52_s23, 0 }
  0x11   : > { %p1810_p8 = por %p73_p5, %p72_p3  ;;  %p164_p10 = scmp.eq.s32.totalorder %s1183_s19, 2 }
  0x12   : > { %p1814_p9 = por %p158_p6, %p66_p1  ;;  %p1540_p12 = scmp.lt.s32.totalorder %s1734_s17, 3 }
  0x13   : > { %s1819_s26 = scalar_select %p57_p7, %s1722_s14, %s59_s21  }
  0x14   : > { %p1821_p11 = por %p164_p10, %p72_p3  ;;  %s1827_s28 = sand.u32 1, %s1722_s14  }
  0x15   : > { %s1186_s29 = sshll.u32 %s1827_s28, 4  ;;  %s1202_s30 = sshll.u32 %s1730_s16, 8 }
  0x16   : > { %s2329_s0 = sld [smem:[#allocation12_spill]]  ;;  %s188_s7 = scalar_lea.vmem [#allocation3], %s1186_s29 }
  0x17   : > { %s198_s8 = sshll.u32 %s188_s7, 4  ;;  %p1836_p13 = pnand %p1540_p12, %p1804_p4  ;;  %s199_s8 = int_to_ptr.vmem [resolvable:$true] %s198_s8 }
  0x18   : > { %p1192_p0 = scmp.ge.s32.totalorder %s1734_s17, 1  ;;  %s185_s10 = scalar_lea.sflag [#allocation4], %s1827_s28 }
  0x19   : > { %p1596_p1 = pneg %p1836_p13  ;;  %s1607_s11 = scalar_lea.vmem %s199_s8, 256 }
  0x1a   : > { %p1608_p2 = scmp.ne.s32.totalorder %s199_s8, %s1607_s11  ;;  %s1736_s18 = smov [#allocation3]  }
  0x1b   : > { %s1612_s19 = sshll.u32 %s1736_s18, 4  ;;  %s1613_s19 = int_to_ptr.vmem [resolvable:$false] %s1612_s19 }
  0x1c   : > { %s197_s6 = scalar_lea.hbm %s2329_s0, %s1202_s30  ;;  %p1610_p3 = pnand %p1608_p2, %p1596_p1 }
  0x1d   : > { %s1614_s21 = scalar_lea.vmem %s1613_s19, 512  ;;  %p1615_p4 = scmp.lt.s32.totalorder %s199_s8, %s1613_s19 }
  0x1e   : > { %p1611_p5 = pneg %p1610_p3  ;;  %p1616_p6 = scmp.lt.s32.totalorder %s1614_s21, %s1607_s11 }
  0x20   : > { %p1617_p7 = por %p1616_p6, %p1615_p4 }
  0x22   : > { %p1618_p10 = pnand %p1617_p7, %p1611_p5 }
  0x24   : > { %1621 = shalt.err (!%p1618_p10)
}
  0x25   : > { %s1737_s22 = smov 128   ;;  %s1738_s23 = smov 8  }
  0x26   : > { %1532 = dma.hbm_to_vmem [thread:$0]  (!%p1836_p13), %s197_s6, 256, %s199_s8, %s185_s10, %s1737_s22, %s1737_s22, %s1738_s23  }
  0x27   : > { %p239_p12 = scmp.lt.s32.totalorder %s1734_s17, 4  ;;  %s1189_s29 = sshll.u32 %s1827_s28, 7 }
  0x28   : > { %s1203_s30 = sshll.u32 %s1730_s16, 11  ;;  %s212_s18 = scalar_lea.vmem [#allocation6], %s1189_s29 }
  0x29   : > { %p1854_p2 = pnand %p1192_p0, %p239_p12  ;;  %s221_s11 = scalar_lea.hbm %s2319_s1, %s1203_s30 }
  0x2a   : > { %s222_s19 = sshll.u32 %s212_s18, 4  ;;  %s209_s21 = scalar_lea.sflag [#allocation7], %s1827_s28  ;;  %s223_s19 = int_to_ptr.vmem [resolvable:$true] %s222_s19 }
  0x2b   : > { %s1635_s0 = scalar_lea.vmem %s223_s19, 2048  ;;  %s1739_s6 = smov [#allocation6]  }
  0x2c   : > { %p1636_p3 = scmp.ne.s32.totalorder %s223_s19, %s1635_s0  ;;  %s1640_s8 = sshll.u32 %s1739_s6, 4  ;;  %s1641_s8 = int_to_ptr.vmem [resolvable:$false] %s1640_s8 }
  0x2d   : > { %s1642_s10 = scalar_lea.vmem %s1641_s8, 4096  ;;  %p1643_p0 = scmp.lt.s32.totalorder %s223_s19, %s1641_s8 }
  0x2e   : > { %p1638_p5 = pnand %p1636_p3, %p1596_p1  ;;  %p1644_p6 = scmp.lt.s32.totalorder %s1642_s10, %s1635_s0 }
  0x30   : > { %p1639_p4 = pneg %p1638_p5  ;;  %p1645_p7 = por %p1644_p6, %p1643_p0 }
  0x32   : > { %p1646_p10 = pnand %p1645_p7, %p1639_p4 }
  0x34   : > { %1649 = shalt.err (!%p1646_p10)
}
  0x35   : > { %1535 = dma.hbm_to_vmem [thread:$0]  (!%p1836_p13), %s221_s11, 2048, %s223_s19, %s209_s21, %s1737_s22, %s1737_s22, %s1738_s23  }
  0x36   : > { %243 = sbr.rel (%p1854_p2) target bundleno = 388 (0x184), region = 32  ;;  %s1870_s28 = sand.u32 (!%p1854_p2), 1, %s1718_s13  }
  0x37   : > { %s1193_s29 = sshll.u32 (!%p1854_p2), %s1870_s28, 4  ;;  %s246_s30 = scalar_lea.sflag (!%p1854_p2), [#allocation4], %s1870_s28 }
  0x38   : > { %s1876_s0 = scalar_lea.vmem (!%p1854_p2), [#allocation3], %s1193_s29 }
  0x3b   : > { %1701 = dma.done.wait (%p1810_p8), %s246_s30, 256  }
  0x3c   : > { %1703 = vsyncadd (%p1810_p8), %s246_s30, 4294967040  ;;  %s1194_s9 = sshll.u32 %s1870_s28, 7  ;;  %s255_s22 = scalar_lea.sflag [#allocation7], %s1870_s28 }
  0x3d   : > { %s1884_s23 = scalar_lea.vmem [#allocation6], %s1194_s9 }
  0x3e   : > { %1705 = dma.done.wait (%p1810_p8), %s255_s22, 2048  }
  0x3f   : > { %1707 = vsyncadd (%p1810_p8), %s255_s22, 4294965248  ;;  %v326_v0 = vld [vmem:[%s1884_s23 + $0x78] sm:$0xff]  ;;  %v325_v1 = vld [vmem:[%s1884_s23 + $0x70] sm:$0xff]  ;;  %p294_p8 = scmp.lt.s32.totalorder %s1726_s15, 2  ;;  %s291_s11 = scalar_lea.vmem [#allocation8], %s1193_s29 }
  0x40   : > { %v324_v2 = vld [vmem:[%s1884_s23 + $0x68] sm:$0xff]  ;;  %v1893_v3 = vand.u32 4294901760, %v326_v0  ;;  %v1895_v4 = vand.u32 4294901760, %v325_v1  ;;  %v323_v6 = vld [vmem:[%s1884_s23 + $0x60] sm:$0xff]  ;;  %v322_v7 = vld [vmem:[%s1884_s23 + $0x58] sm:$0xff]  ;;  %s1048_s18 = sshll.u32 %s291_s11, 4  ;;  %s2266_s18 = int_to_ptr.vmem [resolvable:$true] %s1048_s18 }
  0x41   : > { %v1897_v5 = vand.u32 4294901760, %v324_v2  ;;  %v321_v8 = vld [vmem:[%s1884_s23 + $0x50] sm:$0xff]  ;;  %v1902_v9 = vand.u32 4294901760, %v323_v6  ;;  %v1904_v10 = vand.u32 4294901760, %v322_v7  ;;  %v320_v12 = vld [vmem:[%s1884_s23 + $0x48] sm:$0xff]  ;;  %v319_v13 = vld [vmem:[%s1884_s23 + $0x40] sm:$0xff] }
  0x42   : > { %v1906_v11 = vand.u32 4294901760, %v321_v8  ;;  %1313 = vmatprep.subr.mxu0 %v1893_v3  ;;  %v1912_v14 = vsub.f32 %v326_v0, %v1893_v3  ;;  %v1915_v15 = vsub.f32 %v325_v1, %v1895_v4  ;;  %v1917_v16 = vand.u32 4294901760, %v320_v12  ;;  %v318_v18 = vld [vmem:[%s1884_s23 + $0x38] sm:$0xff]  ;;  %v317_v25 = vld [vmem:[%s1884_s23 + $0x30] sm:$0xff]  ;;  %v316_v35 = vld [vmem:[%s1884_s23 + $0x28] sm:$0xff]  ;;  %s295_s24 = scalar_select %p294_p8, %s1726_s15, 2 }
  0x43   : > { %v1920_v17 = vsub.f32 %v324_v2, %v1897_v5  ;;  %1314 = vmatpush3.msra.mxu0 %v1893_v3  ;;  %v1925_v19 = vsub.f32 %v323_v6, %v1902_v9  ;;  %v1928_v20 = vsub.f32 %v322_v7, %v1904_v10  ;;  %v1940_v24 = vand.u32 4294901760, %v319_v13  ;;  %v315_v40 = vld [vmem:[%s1884_s23 + $0x20] sm:$0xff]  ;;  %v314_v48 = vld [vmem:[%s1884_s23 + $0x18] sm:$0xff]  ;;  %v313_v59 = vld [vmem:[%s1884_s23 + $0x10] sm:$0xff]  ;;  %s1204_s19 = sshll.u32 %s1726_s15, 8  ;;  %s1032_s10 = scalar_lea.sflag [#allocation5], %s1870_s28 }
  0x44   : > { %1315 = vmatprep.subr.mxu0 %v1895_v4  ;;  %v1932_v21 = vand.u32 4294901760, %v1912_v14  ;;  %v1935_v22 = vand.u32 4294901760, %v1915_v15  ;;  %v1947_v27 = vand.u32 4294901760, %v318_v18  ;;  %v1953_v29 = vsub.f32 %v321_v8, %v1906_v11  ;;  %v309_v49 = vld [vmem:[%s1876_s0] sm:$0xff]  ;;  %v310_v54 = vld [vmem:[%s1876_s0 + $0x8] sm:$0xff]  ;;  %s299_s7 = scalar_lea.vmem %s2320_s2, %s295_s24  ;;  %s2271_s8 = scalar_lea.hbm %s2321_s3, %s1204_s19 }
  0x45   : > { %v1938_v23 = vand.u32 4294901760, %v1920_v17  ;;  %1316 = vmatpush3.msra.mxu0 %v1895_v4  ;;  %v1945_v26 = vand.u32 4294901760, %v1925_v19  ;;  %v1950_v28 = vand.u32 4294901760, %v1928_v20  ;;  %v1963_v33 = vsub.f32 %v320_v12, %v1917_v16  ;;  %v312_v2 = vld [vmem:[%s1884_s23 + $0x8] sm:$0xff]  ;;  %s1650_s29 = scalar_lea.vmem %s2266_s18, 256  ;;  %s1740_s15 = smov [#allocation8]  }
  0x46   : > { %1317 = vmatprep.subr.mxu0 %v1897_v5  ;;  %v432_v30 = vsub.f32 %v1912_v14, %v1932_v21  ;;  %v439_v31 = vsub.f32 %v1915_v15, %v1935_v22  ;;  %v1966_v34 = vand.u32 4294901760, %v317_v25  ;;  %v1973_v39 = vand.u32 4294901760, %v1953_v29  ;;  %p1651_p13 = scmp.ne.s32.totalorder %s2266_s18, %s1650_s29  ;;  %s1654_s30 = sshll.u32 %s1740_s15, 4  ;;  %s1655_s30 = int_to_ptr.vmem [resolvable:$false] %s1654_s30 }
  0x47   : > { %v446_v32 = vsub.f32 %v1920_v17, %v1938_v23  ;;  %1318 = vmatpush3.msra.mxu0 %v1897_v5  ;;  %v453_v38 = vsub.f32 %v1925_v19, %v1945_v26  ;;  %v460_v41 = vsub.f32 %v1928_v20, %v1950_v28  ;;  %v1980_v42 = vand.u32 4294901760, %v1963_v33  ;;  %s1656_s0 = scalar_lea.vmem %s1655_s30, 512  ;;  %p1657_p2 = scmp.lt.s32.totalorder %s2266_s18, %s1655_s30 }
  0x48   : > { %1319 = vmatprep.subr.mxu0 %v1902_v9  ;;  %v433_v36 = vand.u32 4294901760, %v432_v30  ;;  %v440_v37 = vand.u32 4294901760, %v439_v31  ;;  %v1983_v43 = vsub.f32 %v319_v13, %v1940_v24  ;;  %v1986_v45 = vand.u32 4294901760, %v316_v35  ;;  %p1652_p1 = pnand %p1651_p13, %p1814_p9  ;;  %p1658_p3 = scmp.lt.s32.totalorder %s1656_s0, %s1650_s29 }
  0x49   : > { %1320 = vmatpush3.msra.mxu0 %v1902_v9  ;;  %v447_v44 = vand.u32 4294901760, %v446_v32  ;;  %v1989_v46 = vsub.f32 %v318_v18, %v1947_v27  ;;  %v1992_v47 = vand.u32 4294901760, %v315_v40  ;;  %v454_v50 = vand.u32 4294901760, %v453_v38  ;;  %v311_v18 = vld [vmem:[%s1884_s23] sm:$0xff] }
  0x4a   : > { %1321 = vmatprep.subr.mxu0 %v1904_v10  ;;  %1348 = vmatprep.subr.mxu1 %v433_v36  ;;  %v467_v51 = vsub.f32 %v1953_v29, %v1973_v39  ;;  %v2000_v52 = vand.u32 4294901760, %v1983_v43  ;;  %v2003_v53 = vsub.f32 %v317_v25, %v1966_v34  ;;  %v461_v55 = vand.u32 4294901760, %v460_v41  ;;  %p1653_p12 = pneg %p1652_p1  ;;  %p1659_p5 = por %p1658_p3, %p1657_p2 }
  0x4b   : > { %1322 = vmatpush3.msra.mxu0 %v1904_v10  ;;  %1349 = vmatpush3.msra.mxu1 %v433_v36  ;;  %v474_v56 = vsub.f32 %v1963_v33, %v1980_v42  ;;  %v2010_v57 = vand.u32 4294901760, %v314_v48  ;;  %v2013_v58 = vand.u32 4294901760, %v1989_v46  ;;  %v2017_v60 = vsub.f32 %v316_v35, %v1986_v45 }
  0x4c   : > { %1323 = vmatprep.subr.mxu0 %v1906_v11  ;;  %1350 = vmatprep.subr.mxu1 %v440_v37  ;;  %v2019_v61 = vand.u32 4294901760, %v309_v49  ;;  %v2022_v62 = vand.u32 4294901760, %v310_v54  ;;  %v468_v63 = vand.u32 4294901760, %v467_v51  ;;  %v481_v0 = vsub.f32 %v1983_v43, %v2000_v52  ;;  %p1660_p4 = pnand %p1659_p5, %p1653_p12 }
  0x4d   : > { %1324 = vmatpush3.msra.mxu0 %v1906_v11  ;;  %1351 = vmatpush3.msra.mxu1 %v440_v37  ;;  %v2028_v1 = vand.u32 4294901760, %v2003_v53  ;;  %v2032_v6 = vsub.f32 %v315_v40, %v1992_v47  ;;  %v475_v7 = vand.u32 4294901760, %v474_v56  ;;  %v2035_v8 = vand.u32 4294901760, %v313_v59 }
  0x4e   : > { %1325 = vmatprep.subr.mxu0 %v1917_v16  ;;  %1352 = vmatprep.subr.mxu1 %v447_v44  ;;  %v488_v12 = vsub.f32 %v1989_v46, %v2013_v58  ;;  %v2041_v13 = vand.u32 4294901760, %v2017_v60  ;;  %v2045_v25 = vsub.f32 %v309_v49, %v2019_v61  ;;  %v2048_v30 = vsub.f32 %v314_v48, %v2010_v57 }
  0x4f   : > { %1326 = vmatpush3.msra.mxu0 %v1917_v16  ;;  %1353 = vmatpush3.msra.mxu1 %v447_v44  ;;  %v2051_v31 = vand.u32 4294901760, %v312_v2  ;;  %v2054_v32 = vsub.f32 %v310_v54, %v2022_v62  ;;  %v482_v35 = vand.u32 4294901760, %v481_v0  ;;  %v495_v36 = vsub.f32 %v2003_v53, %v2028_v1 }
  0x50   : > { %1327 = vmatprep.subr.mxu0 %v1940_v24  ;;  %1354 = vmatprep.subr.mxu1 %v454_v50  ;;  %v2060_v37 = vand.u32 4294901760, %v2032_v6  ;;  %v2063_v38 = vand.u32 4294901760, %v311_v18  ;;  %v2066_v40 = vsub.f32 %v313_v59, %v2035_v8  ;;  %v489_v41 = vand.u32 4294901760, %v488_v12 }
  0x51   : > { %1328 = vmatpush3.msra.mxu0 %v1940_v24  ;;  %1355 = vmatpush3.msra.mxu1 %v454_v50  ;;  %v502_v44 = vsub.f32 %v2017_v60, %v2041_v13  ;;  %v2323_v48 = vand.u32 4294901760, %v2045_v25  ;;  %v2073_v49 = vand.u32 4294901760, %v2048_v30  ;;  %v2322_v50 = vand.u32 4294901760, %v2054_v32 }
  0x52   : > { %1329 = vmatprep.subr.mxu0 %v1947_v27  ;;  %1356 = vmatprep.subr.mxu1 %v461_v55  ;;  %v2078_v51 = vsub.f32 %v312_v2, %v2051_v31  ;;  %v496_v54 = vand.u32 4294901760, %v495_v36  ;;  %v2085_v56 = vand.u32 4294901760, %v2066_v40  ;;  %v2088_v59 = vsub.f32 %v311_v18, %v2063_v38 }
  0x53   : > { %1330 = vmatpush3.msra.mxu0 %v1947_v27  ;;  %1357 = vmatpush3.msra.mxu1 %v461_v55  ;;  %v509_v55 = vsub.f32 %v2032_v6, %v2060_v37  ;;  %v411_v0 = vsub.f32 %v2045_v25, %v2323_v48  ;;  %v516_v2 = vsub.f32 %v2048_v30, %v2073_v49 }
  0x54   : > { %1331 = vmatprep.subr.mxu0 %v1966_v34  ;;  %1358 = vmatprep.subr.mxu1 %v468_v63  ;;  %v2101_v12 = vand.u32 4294901760, %v2078_v51  ;;  %v2108_v36 = vand.u32 4294901760, %v2088_v59 }
  0x55   : > { %1332 = vmatpush3.msra.mxu0 %v1966_v34  ;;  %1359 = vmatpush3.msra.mxu1 %v468_v63  ;;  %v503_v63 = vand.u32 4294901760, %v502_v44  ;;  %v510_v18 = vand.u32 4294901760, %v509_v55  ;;  %v517_v44 = vand.u32 4294901760, %v516_v2 }
  0x56   : > { %1333 = vmatprep.subr.mxu0 %v1986_v45  ;;  %1360 = vmatprep.subr.mxu1 %v475_v7  ;;  %v530_v55 = vsub.f32 %v2078_v51, %v2101_v12  ;;  %v537_v48 = vsub.f32 %v2088_v59, %v2108_v36 }
  0x57   : > { %1334 = vmatpush3.msra.mxu0 %v1986_v45  ;;  %1361 = vmatpush3.msra.mxu1 %v475_v7  ;;  %v421_v7 = vsub.f32 %v2054_v32, %v2322_v50 }
  0x58   : > { %1335 = vmatprep.subr.mxu0 %v1992_v47  ;;  %1362 = vmatprep.subr.mxu1 %v482_v35 }
  0x59   : > { %1336 = vmatpush3.msra.mxu0 %v1992_v47  ;;  %1363 = vmatpush3.msra.mxu1 %v482_v35  ;;  %v523_v35 = vsub.f32 %v2066_v40, %v2085_v56  ;;  %v422_v50 = vand.u32 4294901760, %v421_v7 }
  0x5a   : > { %1337 = vmatprep.subr.mxu0 %v2010_v57  ;;  %1364 = vmatprep.subr.mxu1 %v489_v41 }
  0x5b   : > { %1338 = vmatpush3.msra.mxu0 %v2010_v57  ;;  %1365 = vmatpush3.msra.mxu1 %v489_v41  ;;  %v412_v41 = vand.u32 4294901760, %v411_v0  ;;  %v538_v0 = vand.u32 4294901760, %v537_v48 }
  0x5c   : > { %1339 = vmatprep.subr.mxu0 %v2035_v8  ;;  %1366 = vmatprep.subr.mxu1 %v496_v54 }
  0x5d   : > { %1340 = vmatpush3.msra.mxu0 %v2035_v8  ;;  %1367 = vmatpush3.msra.mxu1 %v496_v54  ;;  %v524_v54 = vand.u32 4294901760, %v523_v35 }
  0x5e   : > { %1341 = vmatprep.subr.mxu0 %v2051_v31  ;;  %1368 = vmatprep.subr.mxu1 %v503_v63 }
  0x5f   : > { %1342 = vmatpush3.msra.mxu0 %v2051_v31  ;;  %1369 = vmatpush3.msra.mxu1 %v503_v63  ;;  %v531_v63 = vand.u32 4294901760, %v530_v55 }
  0x60   : > { %1343 = vmatprep.subr.mxu0 %v2063_v38  ;;  %1370 = vmatprep.subr.mxu1 %v510_v18 }
  0x61   : > { %1344 = vmatpush3.msra.mxu0 %v2063_v38  ;;  %1371 = vmatpush3.msra.mxu1 %v510_v18 }
  0x62   : > { %1345 = vmatprep.mubr.f32.mxu0 %v412_v41  ;;  %1372 = vmatprep.subr.mxu1 %v517_v44 }
  0x63   : > { %1383 = vmatprep.subr.mxu0 %v1912_v14  ;;  %1346 = vmatmul.mubr.f32.vlgmr.msra.gmra.mxu0 %v422_v50 }
  0x64   : > { %1373 = vmatpush3.msra.mxu1 %v517_v44  ;;  %1384 = vmatpush3.msra.mxu0 %v1912_v14  ;;  %v2332_v14 = vand.u32 4294901760, %v2045_v25 }
  0x65   : > { %1374 = vmatprep.subr.mxu1 %v524_v54  ;;  %1385 = vmatprep.subr.mxu0 %v1915_v15 }
  0x66   : > { %1375 = vmatpush3.msra.mxu1 %v524_v54  ;;  %1386 = vmatpush3.msra.mxu0 %v1915_v15  ;;  %v2333_v15 = vand.u32 4294901760, %v2054_v32 }
  0x67   : > { %1376 = vmatprep.subr.mxu1 %v531_v63  ;;  %1387 = vmatprep.subr.mxu0 %v1920_v17 }
  0x68   : > { %1377 = vmatpush3.msra.mxu1 %v531_v63  ;;  %1388 = vmatpush3.msra.mxu0 %v1920_v17 }
  0x69   : > { %1378 = vmatprep.subr.mxu1 %v538_v0  ;;  %1389 = vmatprep.subr.mxu0 %v1925_v19 }
  0x6a   : > { %1379 = vmatpush3.msra.mxu1 %v538_v0  ;;  %1380 = vmatprep.mubr.f32.mxu1 %v2019_v61 }
  0x6b   : > { %1390 = vmatpush3.msra.mxu0 %v1925_v19  ;;  %1381 = vmatmul.mubr.f32.vlgmr.msra.gmra.mxu1 %v2022_v62 }
  0x6c   : > { %1391 = vmatprep.subr.mxu0 %v1928_v20  ;;  %1418 = vmatprep.subr.mxu1 %v1893_v3 }
  0x6d   : > { %1392 = vmatpush3.msra.mxu0 %v1928_v20  ;;  %1419 = vmatpush3.msra.mxu1 %v1893_v3 }
  0x6e   : > { %1393 = vmatprep.subr.mxu0 %v1953_v29  ;;  %1420 = vmatprep.subr.mxu1 %v1895_v4 }
  0x6f   : > { %1394 = vmatpush3.msra.mxu0 %v1953_v29  ;;  %1421 = vmatpush3.msra.mxu1 %v1895_v4 }
  0x70   : > { %1395 = vmatprep.subr.mxu0 %v1963_v33  ;;  %1422 = vmatprep.subr.mxu1 %v1897_v5 }
  0x71   : > { %1396 = vmatpush3.msra.mxu0 %v1963_v33  ;;  %1423 = vmatpush3.msra.mxu1 %v1897_v5  ;;  %v1196_v33 = vld [vmem:[%s299_s7] ss:$0 sm:$0xff] }
  0x72   : > { %1397 = vmatprep.subr.mxu0 %v1983_v43  ;;  %1424 = vmatprep.subr.mxu1 %v1902_v9 }
  0x73   : > { %1398 = vmatpush3.msra.mxu0 %v1983_v43  ;;  %1425 = vmatpush3.msra.mxu1 %v1902_v9 }
  0x74   : > { %1399 = vmatprep.subr.mxu0 %v1989_v46  ;;  %1426 = vmatprep.subr.mxu1 %v1904_v10 }
  0x75   : > { %1400 = vmatpush3.msra.mxu0 %v1989_v46  ;;  %1427 = vmatpush3.msra.mxu1 %v1904_v10 }
  0x76   : > { %1401 = vmatprep.subr.mxu0 %v2003_v53  ;;  %1428 = vmatprep.subr.mxu1 %v1906_v11 }
  0x77   : > { %1402 = vmatpush3.msra.mxu0 %v2003_v53  ;;  %1429 = vmatpush3.msra.mxu1 %v1906_v11 }
  0x78   : > { %1403 = vmatprep.subr.mxu0 %v2017_v60  ;;  %1430 = vmatprep.subr.mxu1 %v1917_v16 }
  0x79   : > { %1404 = vmatpush3.msra.mxu0 %v2017_v60  ;;  %1431 = vmatpush3.msra.mxu1 %v1917_v16 }
  0x7a   : > { %1405 = vmatprep.subr.mxu0 %v2032_v6  ;;  %1432 = vmatprep.subr.mxu1 %v1940_v24 }
  0x7b   : > { %1406 = vmatpush3.msra.mxu0 %v2032_v6  ;;  %1433 = vmatpush3.msra.mxu1 %v1940_v24 }
  0x7c   : > { %1407 = vmatprep.subr.mxu0 %v2048_v30  ;;  %1434 = vmatprep.subr.mxu1 %v1947_v27 }
  0x7d   : > { %1408 = vmatpush3.msra.mxu0 %v2048_v30  ;;  %1435 = vmatpush3.msra.mxu1 %v1947_v27 }
  0x7e   : > { %1409 = vmatprep.subr.mxu0 %v2066_v40  ;;  %1436 = vmatprep.subr.mxu1 %v1966_v34 }
  0x7f   : > { %1410 = vmatpush3.msra.mxu0 %v2066_v40  ;;  %1437 = vmatpush3.msra.mxu1 %v1966_v34 }
  0x80   : > { %1411 = vmatprep.subr.mxu0 %v2078_v51  ;;  %1438 = vmatprep.subr.mxu1 %v1986_v45 }
  0x81   : > { %1412 = vmatpush3.msra.mxu0 %v2078_v51  ;;  %1439 = vmatpush3.msra.mxu1 %v1986_v45 }
  0x82   : > { %1413 = vmatprep.subr.mxu0 %v2088_v59  ;;  %1440 = vmatprep.subr.mxu1 %v1992_v47 }
  0x83   : > { %1414 = vmatpush3.msra.mxu0 %v2088_v59  ;;  %1415 = vmatprep.mubr.f32.mxu0 %v2045_v25 }
  0x84   : > { %1441 = vmatpush3.msra.mxu1 %v1992_v47  ;;  %1416 = vmatmul.mubr.f32.vlgmr.msra.gmra.mxu0 %v2054_v32 }
  0x85   : > { %1442 = vmatprep.subr.mxu1 %v2010_v57  ;;  %1453 = vmatprep.subr.mxu0 %v1932_v21 }
  0x86   : > { %1443 = vmatpush3.msra.mxu1 %v2010_v57  ;;  %1454 = vmatpush3.msra.mxu0 %v1932_v21 }
  0x87   : > { %1444 = vmatprep.subr.mxu1 %v2035_v8  ;;  %1455 = vmatprep.subr.mxu0 %v1935_v22 }
  0x88   : > { %1445 = vmatpush3.msra.mxu1 %v2035_v8  ;;  %1456 = vmatpush3.msra.mxu0 %v1935_v22 }
  0x89   : > { %1446 = vmatprep.subr.mxu1 %v2051_v31  ;;  %1457 = vmatprep.subr.mxu0 %v1938_v23 }
  0x8a   : > { %1447 = vmatpush3.msra.mxu1 %v2051_v31  ;;  %1458 = vmatpush3.msra.mxu0 %v1938_v23 }
  0x8b   : > { %1448 = vmatprep.subr.mxu1 %v2063_v38  ;;  %1459 = vmatprep.subr.mxu0 %v1945_v26 }
  0x8c   : > { %1449 = vmatpush3.msra.mxu1 %v2063_v38  ;;  %1450 = vmatprep.mubr.f32.mxu1 %v2332_v14 }
  0x8d   : > { %1460 = vmatpush3.msra.mxu0 %v1945_v26  ;;  %1451 = vmatmul.mubr.f32.vlgmr.msra.gmra.mxu1 %v2333_v15 }
  0x8e   : > { %1461 = vmatprep.subr.mxu0 %v1950_v28  ;;  %1488 = vmatprep.subr.mxu1 %v1893_v3 }
  0x8f   : > { %1462 = vmatpush3.msra.mxu0 %v1950_v28  ;;  %1489 = vmatpush3.msra.mxu1 %v1893_v3 }
  0x90   : > { %1463 = vmatprep.subr.mxu0 %v1973_v39  ;;  %1490 = vmatprep.subr.mxu1 %v1895_v4 }
  0x91   : > { %1464 = vmatpush3.msra.mxu0 %v1973_v39  ;;  %1491 = vmatpush3.msra.mxu1 %v1895_v4 }
  0x92   : > { %1465 = vmatprep.subr.mxu0 %v1980_v42  ;;  %1492 = vmatprep.subr.mxu1 %v1897_v5 }
  0x93   : > { %1466 = vmatpush3.msra.mxu0 %v1980_v42  ;;  %1493 = vmatpush3.msra.mxu1 %v1897_v5 }
  0x94   : > { %1467 = vmatprep.subr.mxu0 %v2000_v52  ;;  %1494 = vmatprep.subr.mxu1 %v1902_v9 }
  0x95   : > { %1468 = vmatpush3.msra.mxu0 %v2000_v52  ;;  %1495 = vmatpush3.msra.mxu1 %v1902_v9 }
  0x96   : > { %1469 = vmatprep.subr.mxu0 %v2013_v58  ;;  %1496 = vmatprep.subr.mxu1 %v1904_v10 }
  0x97   : > { %1470 = vmatpush3.msra.mxu0 %v2013_v58  ;;  %1497 = vmatpush3.msra.mxu1 %v1904_v10 }
  0x98   : > { %1471 = vmatprep.subr.mxu0 %v2028_v1  ;;  %1498 = vmatprep.subr.mxu1 %v1906_v11 }
  0x99   : > { %1472 = vmatpush3.msra.mxu0 %v2028_v1  ;;  %1499 = vmatpush3.msra.mxu1 %v1906_v11 }
  0x9a   : > { %1473 = vmatprep.subr.mxu0 %v2041_v13  ;;  %1500 = vmatprep.subr.mxu1 %v1917_v16 }
  0x9b   : > { %1474 = vmatpush3.msra.mxu0 %v2041_v13  ;;  %1501 = vmatpush3.msra.mxu1 %v1917_v16 }
  0x9c   : > { %1475 = vmatprep.subr.mxu0 %v2060_v37  ;;  %1502 = vmatprep.subr.mxu1 %v1940_v24 }
  0x9d   : > { %1476 = vmatpush3.msra.mxu0 %v2060_v37  ;;  %1503 = vmatpush3.msra.mxu1 %v1940_v24 }
  0x9e   : > { %1477 = vmatprep.subr.mxu0 %v2073_v49  ;;  %1504 = vmatprep.subr.mxu1 %v1947_v27 }
  0x9f   : > { %1478 = vmatpush3.msra.mxu0 %v2073_v49  ;;  %1505 = vmatpush3.msra.mxu1 %v1947_v27 }
  0xa0   : > { %1479 = vmatprep.subr.mxu0 %v2085_v56  ;;  %1506 = vmatprep.subr.mxu1 %v1966_v34 }
  0xa1   : > { %1480 = vmatpush3.msra.mxu0 %v2085_v56  ;;  %1507 = vmatpush3.msra.mxu1 %v1966_v34 }
  0xa2   : > { %1481 = vmatprep.subr.mxu0 %v2101_v12  ;;  %1508 = vmatprep.subr.mxu1 %v1986_v45 }
  0xa3   : > { %1482 = vmatpush3.msra.mxu0 %v2101_v12  ;;  %1509 = vmatpush3.msra.mxu1 %v1986_v45 }
  0xa4   : > { %1483 = vmatprep.subr.mxu0 %v2108_v36  ;;  %1510 = vmatprep.subr.mxu1 %v1992_v47 }
  0xa5   : > { %1484 = vmatpush3.msra.mxu0 %v2108_v36  ;;  %1485 = vmatprep.mubr.f32.mxu0 %v2019_v61 }
  0xa6   : > { %1511 = vmatpush3.msra.mxu1 %v1992_v47  ;;  %1486 = vmatmul.mubr.f32.vlgmr.msra.gmra.mxu0 %v2022_v62 }
  0xa7   : > { %1512 = vmatprep.subr.mxu1 %v2010_v57  ;;  %1520 = vmatprep.mubr.f32.mxu1 %v2019_v61 }
  0xa8   : > { %1513 = vmatpush3.msra.mxu1 %v2010_v57 }
  0xa9   : > { %1514 = vmatprep.subr.mxu1 %v2035_v8 }
  0xaa   : > { %1515 = vmatpush3.msra.mxu1 %v2035_v8 }
  0xab   : > { %1516 = vmatprep.subr.mxu1 %v2051_v31 }
  0xac   : > { %1517 = vmatpush3.msra.mxu1 %v2051_v31 }
  0xad   : > { %1518 = vmatprep.subr.mxu1 %v2063_v38 }
  0xae   : > { %1519 = vmatpush3.msra.mxu1 %v2063_v38 }
  0xaf   : > { %1521 = vmatmul.mubr.f32.vlgmr.msra.gmra.mxu1 %v2022_v62 }
 0x123   : > { %v1347_v3 = vpop.f32.mrf.mxu0 }
 0x125   : > { %v414_v4 = vpop.f32.mrf.mxu0 }
 0x12b   : > { %v1382_v5 = vpop.f32.mrf.mxu1 }
 0x12c   : > { %v582_v17 = vadd.f32 %v1382_v5, %v1347_v3 }
 0x12d   : > { %v575_v10 = vpop.f32.mrf.mxu1 }
 0x12e   : > { %v576_v20 = vadd.f32 %v575_v10, %v414_v4 }
 0x144   : > { %v1417_v9 = vpop.f32.mrf.mxu0 }
 0x145   : > { %v693_v21 = vadd.f32 %v1417_v9, %v582_v17 }
 0x146   : > { %v685_v11 = vpop.f32.mrf.mxu0 }
 0x147   : > { %v686_v23 = vadd.f32 %v685_v11, %v576_v20 }
 0x14d   : > { %v1452_v16 = vpop.f32.mrf.mxu1 }
 0x14e   : > { %v790_v24 = vadd.f32 %v1452_v16, %v693_v21 }
 0x14f   : > { %v781_v22 = vpop.f32.mrf.mxu1 }
 0x150   : > { %v782_v27 = vadd.f32 %v781_v22, %v686_v23 }
 0x166   : > { %v1487_v19 = vpop.f32.mrf.mxu0 }
 0x167   : > { %v915_v28 = vadd.f32 %v1487_v19, %v790_v24 }
 0x168   : > { %v908_v26 = vpop.f32.mrf.mxu0 }
 0x169   : > { %v909_v34 = vadd.f32 %v908_v26, %v782_v27 }
 0x16f   : > { %v1522_v29 = vpop.f32.mrf.mxu1 }
 0x170   : > { %v1008_v39 = vadd.f32 %v1522_v29, %v915_v28 }
 0x171   : > { %v1001_v42 = vpop.f32.mrf.mxu1 }
 0x172   : > { %v1028_v43 = vadd.f32 %v1196_v33, %v1008_v39  ;;  %v1002_v45 = vadd.f32 %v1001_v42, %v909_v34 }
 0x174   : > { %1030 = vst [vmem:[%s291_s11 + $0x8] sm:$0xff] %v1028_v43  ;;  %v1027_v46 = vadd.f32 %v1196_v33, %v1002_v45 }
 0x176   : > { %1029 = vst [vmem:[%s291_s11] sm:$0xff] %v1027_v46 }
 0x177   : > { %1663 = shalt.err (!%p1660_p4)
}
 0x178   : > { %s1664_s9 = scalar_lea.hbm %s2271_s8, 256  ;;  %s1668_s24 = scalar_lea.hbm %s2321_s3, 768 }
 0x179   : > { %p1665_p0 = scmp.ne.s32.totalorder %s2271_s8, %s1664_s9  ;;  %p1669_p10 = scmp.lt.s32.totalorder %s2271_s8, %s2321_s3 }
 0x17a   : > { %p1670_p8 = scmp.lt.s32.totalorder %s1668_s24, %s1664_s9 }
 0x17b   : > { %p1666_p6 = pnand %p1665_p0, %p1814_p9 }
 0x17c   : > { %p1671_p13 = por %p1670_p8, %p1669_p10 }
 0x17d   : > { %p1667_p7 = pneg %p1666_p6 }
 0x17f   : > { %p1672_p1 = pnand %p1671_p13, %p1667_p7 }
 0x181   : > { %1675 = shalt.err (!%p1672_p1)
}
 0x182   : > { %s1741_s7 = smov 128   ;;  %s1742_s11 = smov 8  }
 0x183   : > { %1527 = dma.vmem_to_hbm [thread:$0]  (%p1814_p9), %s2266_s18, 256, %s2271_s8, %s1032_s10, %s1741_s7, %s1741_s7, %s1742_s11  }
 0x184 PF: > { %p1541_p12 = scmp.ge.s32.totalorder %s1734_s17, 2  ;;  %s1063_s19 = sand.u32 1, %s1714_s12  }
 0x185   : > { %s1064_s21 = scalar_lea.sflag [#allocation5], %s1063_s19 }
 0x186   : > { %p1537_p2 = pnand %p1541_p12, %p1821_p11 }
 0x188   : > { %p1538_p3 = pneg %p1537_p2 }
 0x18a   : > { %1709 = dma.done.wait (%p1538_p3), %s1064_s21, 256  }
 0x18b   : > { %1711 = vsyncadd (%p1538_p3), %s1064_s21, 4294967040  ;;  %s22_s17 = sadd.s32 1, %s1734_s17   ;;  %s2334_s12 = smov %s1718_s13 }
 0x18c   : > { %p19_p5 = scmp.ge.s32.totalorder %s22_s17, 5   ;;  %s2335_s13 = smov %s1722_s14 }
 0x18d   : > { %s2336_s14 = smov %s1819_s26  ;;  %s2337_s15 = smov %s1730_s16 }
 0x18e   : > { %s2338_s16 = smov %s2340_s20  ;;  %21 = sbr.rel (!%p19_p5) target bundleno = 10 (0xa), region = 101 }
 0x193   :  { %1069 = vsyncpa [#allocation4], 1 }
 0x194   :  { %1071 = vsyncpa [#allocation4 + $0x1], 1 }
 0x195   :  { %1072 = vsyncpa [#allocation7], 1 }
 0x196   :  { %1074 = vsyncpa [#allocation7 + $0x1], 1 }
 0x197   :  { %1075 = vsyncpa [#allocation5], 1 }
 0x198   :  { %1077 = vsyncpa [#allocation5 + $0x1], 1 }

</bundles_post_ra>
